<compile_context>
chip_gen: v6e
topology: v6e:2x2x1
jax: 0.10.0
libtpu: 0.0.40
codegen_flags: <defaults>
</compile_context>

<pallas_src>
import math

import jax
import jax.numpy as jnp
import numpy as np
from jax.experimental import pallas as pl
from jax.experimental.pallas import tpu as pltpu


def _penc_broadcast_kernel(tx_ref, ty_ref, o_ref):
    # tx_ref: (tc, X) f32, ty_ref: (tc, Y) f32, o_ref: (tc, X, Y) out dtype.
    tx = tx_ref[...]                               # (tc, X)
    ty = ty_ref[...]                               # (tc, Y)
    # Exactly one of the two tables is nonzero for any channel, so the sum
    # reproduces the interleaved sin/cos encoding.  Pure VPU add + store.
    val = tx[:, :, None] + ty[:, None, :]          # (tc, X, Y), f32
    o_ref[...] = val.astype(o_ref.dtype)


def _pick_channel_block(C, X, Y, itemsize, budget_bytes=2 << 20):
    """Largest channel tile that divides C, is a multiple of 8 (or == C, to
    satisfy the (8,128) rule on the (tc, X)/(tc, Y) input blocks), and keeps
    the (tc, X, Y) output tile within a conservative VMEM budget."""
    per_ch = max(X * Y * itemsize, 1)
    max_tc = max(1, budget_bytes // per_ch)
    if C <= max_tc:
        return C
    best = None
    cand = 8
    while cand <= max_tc:
        if C % cand == 0:
            best = cand
        cand += 8
    return best if best is not None else C


def positional_encoding_permute_2d(x):
    """Pallas equivalent of PositionalEncodingPermute2D(channels).forward(x).

    x: (batch, channels, X, Y)  ->  encoding of the same shape/dtype.
    """
    B, C, X, Y = x.shape
    half = int(math.ceil(C / 4) * 2)          # "self.channels" of PositionalEncoding2D

    # --- tiny separable tables, computed once (O(C*(X+Y)) transcendentals) ---
    inv_freq = 1.0 / (10000.0 ** (jnp.arange(0, half, 2, dtype=jnp.float32) / half))
    pos_x = jnp.arange(X, dtype=jnp.float32)
    pos_y = jnp.arange(Y, dtype=jnp.float32)
    sin_inp_x = pos_x[:, None] * inv_freq[None, :]              # (X, half//2)
    sin_inp_y = pos_y[:, None] * inv_freq[None, :]              # (Y, half//2)
    emb_x = jnp.stack((jnp.sin(sin_inp_x), jnp.cos(sin_inp_x)), -1).reshape(X, half)
    emb_y = jnp.stack((jnp.sin(sin_inp_y), jnp.cos(sin_inp_y)), -1).reshape(Y, half)
    # Channel-major tables: rows [0, half) carry emb_x, rows [half, 2*half)
    # carry emb_y; slice to C (C <= 2*half always).
    table_x = jnp.concatenate(
        [emb_x.T, jnp.zeros((half, X), jnp.float32)], axis=0)[:C]   # (C, X)
    table_y = jnp.concatenate(
        [jnp.zeros((half, Y), jnp.float32), emb_y.T], axis=0)[:C]   # (C, Y)

    tc = _pick_channel_block(C, X, Y, jnp.dtype(x.dtype).itemsize)
    grid = (B, C // tc)

    return pl.pallas_call(
        _penc_broadcast_kernel,
        out_shape=jax.ShapeDtypeStruct((B, C, X, Y), x.dtype),
        grid=grid,
        in_specs=[
            pl.BlockSpec((tc, X), lambda b, ci: (ci, 0)),
            pl.BlockSpec((tc, Y), lambda b, ci: (ci, 0)),
        ],
        out_specs=pl.BlockSpec((None, tc, X, Y), lambda b, ci: (b, ci, 0, 0)),
        compiler_params=pltpu.CompilerParams(
            dimension_semantics=("parallel", "parallel"),
            vmem_limit_bytes=64 << 20),
    )(table_x, table_y)


def _reference_numpy(x):
    """Pure-numpy port of the PyTorch module, for verification."""
    B, C, X, Y = x.shape
    half = int(np.ceil(C / 4) * 2)
    inv_freq = 1.0 / (10000.0 ** (np.arange(0, half, 2, dtype=np.float32) / half))
    pos_x = np.arange(X, dtype=np.float32)
    pos_y = np.arange(Y, dtype=np.float32)
    sin_inp_x = np.einsum("i,j->ij", pos_x, inv_freq)
    sin_inp_y = np.einsum("i,j->ij", pos_y, inv_freq)
    emb_x = np.stack((np.sin(sin_inp_x), np.cos(sin_inp_x)), -1).reshape(X, half)
    emb_y = np.stack((np.sin(sin_inp_y), np.cos(sin_inp_y)), -1).reshape(Y, half)
    emb = np.zeros((X, Y, 2 * half), dtype=np.float32)
    emb[:, :, :half] = emb_x[:, None, :]
    emb[:, :, half:] = emb_y[None, :, :]
    out = np.broadcast_to(emb[None, :, :, :C], (B, X, Y, C))
    return np.transpose(out, (0, 3, 1, 2)).astype(x.dtype)


if __name__ == "__main__":
    key = jax.random.PRNGKey(0)
    # NCHW, like the PyTorch module's input (values are unused by the forward).
    x = jax.random.normal(key, (2, 4, 16, 16), dtype=jnp.float32)

    out = positional_encoding_permute_2d(x)
    out = jax.block_until_ready(out)

    ref = _reference_numpy(np.asarray(x))
    np.testing.assert_allclose(np.asarray(out), ref, rtol=1e-5, atol=1e-5)
    assert out.shape == x.shape and out.dtype == x.dtype

    print("KERNEL_OK")
</pallas_src>

<mosaic_0001>
module attributes {stable_mosaic.version = 11 : i64} {
  func.func @_penc_broadcast_kernel(%arg0: i32, %arg1: i32, %arg2: memref<4x16xf32, #tpu.memory_space<vmem>>, %arg3: memref<4x16xf32, #tpu.memory_space<vmem>>, %arg4: memref<1x4x16x16xf32, #tpu.memory_space<vmem>>) attributes {dimension_semantics = [#tpu.dimension_semantics<parallel>, #tpu.dimension_semantics<parallel>], iteration_bounds = array<i64: 2, 1>, scalar_prefetch = 0 : i64, scratch_operands = 0 : i64, tpu.core_type = #tpu.core_type<tc>, window_params = [{transform_indices = @transform_0, window_bounds = array<i64: 4, 16>}, {transform_indices = @transform_1, window_bounds = array<i64: 4, 16>}, {transform_indices = @transform_2, window_bounds = array<i64: 1, 4, 16, 16>}]} {
    %c0 = arith.constant 0 : index
    %c0_0 = arith.constant 0 : index
    %0 = vector.load %arg2[%c0, %c0_0] : memref<4x16xf32, #tpu.memory_space<vmem>>, vector<4x16xf32>
    %c0_1 = arith.constant 0 : index
    %c0_2 = arith.constant 0 : index
    %1 = vector.load %arg3[%c0_1, %c0_2] : memref<4x16xf32, #tpu.memory_space<vmem>>, vector<4x16xf32>
    %2 = vector.shape_cast %0 : vector<4x16xf32> to vector<4x16x1xf32>
    %3 = vector.shape_cast %1 : vector<4x16xf32> to vector<4x1x16xf32>
    %4 = vector.broadcast %2 : vector<4x16x1xf32> to vector<4x16x16xf32>
    %5 = vector.broadcast %3 : vector<4x1x16xf32> to vector<4x16x16xf32>
    %6 = arith.addf %4, %5 : vector<4x16x16xf32>
    %c0_3 = arith.constant 0 : index
    %c0_4 = arith.constant 0 : index
    %c0_5 = arith.constant 0 : index
    %c0_6 = arith.constant 0 : index
    %7 = vector.load %arg4[%c0_3, %c0_4, %c0_5, %c0_6] : memref<1x4x16x16xf32, #tpu.memory_space<vmem>>, vector<1x4x16x16xf32>
    %8 = vector.shape_cast %7 : vector<1x4x16x16xf32> to vector<4x16x16xf32>
    %9 = vector.shape_cast %6 : vector<4x16x16xf32> to vector<1x4x16x16xf32>
    tpu.vector_store %arg4[%c0_3, %c0_4, %c0_5, %c0_6], %9 {strides = array<i32>} : memref<1x4x16x16xf32, #tpu.memory_space<vmem>>, vector<1x4x16x16xf32>,
    return
  }
  func.func @transform_0(%arg0: i32, %arg1: i32) -> (i32, i32) {
    %c0_i32 = arith.constant 0 : i32
    %c0_i32_0 = arith.constant 0 : i32
    return %arg1, %c0_i32 : i32, i32
  }
  func.func @transform_1(%arg0: i32, %arg1: i32) -> (i32, i32) {
    %c0_i32 = arith.constant 0 : i32
    %c0_i32_0 = arith.constant 0 : i32
    return %arg1, %c0_i32 : i32, i32
  }
  func.func @transform_2(%arg0: i32, %arg1: i32) -> (i32, i32, i32, i32) {
    %c0_i32 = arith.constant 0 : i32
    %c0_i32_0 = arith.constant 0 : i32
    %c0_i32_1 = arith.constant 0 : i32
    return %arg0, %arg1, %c0_i32, %c0_i32_0 : i32, i32, i32, i32
  }
}

</mosaic_0001>

<bundles_post_ra>
// kernel: tpu_custom_call.1
= control target key start
LH: loop header
LB: loop body
LE: loop exit
PB: predicated region body
PF: predicated region fallthrough
CT: control target
= control target key end

     0   :  { %7 = vsyncpa [#allocation3], 0  ;;  %s808_s0 = inlined_call_operand.hbm [shape: f32[4,16], index: 0, kind: input, shape index: {}]   ;;  %s809_s1 = inlined_call_operand.hbm [shape: f32[4,16], index: 1, kind: input, shape index: {}]   ;;  %s810_s2 = inlined_call_operand.hbm [shape: f32[2,4,16,16], index: 2, kind: output, shape index: {}]  }
   0x1   :  { %8 = vsyncpa [#allocation6], 0 }
   0x2   :  { %9 = vsyncpa [#allocation4], 0 }
   0x3   :  { %11 = vsyncpa [#allocation4 + $0x1], 0  ;;  %s643_s9 = smov 0   ;;  %s645_s10 = smov 0  }
   0x4   :  { %s647_s11 = smov 0   ;;  %s649_s12 = smov 0  }
   0x5   :  { %s651_s13 = smov 0   ;;  %s653_s14 = smov 0  }
   0x6 LB: > { %s389_s15 = sadd.s32 4294967295, %s620_s14   ;;  %s390_s16 = sadd.s32 4294967294, %s620_s14   ;;  %s620_s14 = sphi %s653_s14, %s17_s14   ;;  %s616_s13 = sphi %s651_s13, %s828_s13   ;;  %s612_s12 = sphi %s649_s12, %s827_s12   ;;  %s608_s11 = sphi %s647_s11, %s826_s11   ;;  %s604_s10 = sphi %s645_s10, %s825_s10   ;;  %s600_s9 = sphi %s643_s9, %s824_s9  }
   0x7   : > { %s29_s17 = sadd.s32 1, %s616_s13  ;;  %s90_s18 = sadd.s32 1, %s608_s11 }
   0x8   : > { %p31_p0 = scmp.ge.s32.totalorder %s29_s17, 2  ;;  %p100_p1 = scmp.ne.s32.totalorder %s608_s11, %s604_s10 }
   0x9   : > { %p101_p2 = scmp.eq.s32.totalorder %s389_s15, 1  ;;  %p106_p3 = scmp.ne.s32.totalorder %s604_s10, %s600_s9 }
   0xa   : > { %s830_s17 = smov (%p31_p0, %s29_s17), 0  ;;  %p107_p5 = scmp.eq.s32.totalorder %s390_s16, 1 }
   0xb   : > { %p683_p4 = por %p101_p2, %p100_p1  ;;  %s85_s20 = ssub.s32 %s616_s13, %s830_s17 }
   0xc   : > { %p391_p6 = scmp.ge.s32.totalorder %s620_s14, 1  ;;  %p88_p7 = scmp.eq.s32.totalorder %s85_s20, 0 }
   0xd   : > { %s815_s19 = scalar_select %p683_p4, 1, 0 }
   0xe   : > { %p690_p8 = por %p107_p5, %p106_p3  ;;  %p114_p9 = scmp.lt.s32.totalorder %s620_s14, 3 }
   0xf   : > { %s696_s22 = scalar_select %p88_p7, %s608_s11, %s90_s18  }
  0x10   : > { %s816_s21 = scalar_select %p690_p8, 1, 0 }
  0x11   : > { %p698_p10 = pnand %p391_p6, %p114_p9  ;;  %p702_p11 = scmp.eq.s32.totalorder %s389_s15, 0 }
  0x12   : > { %s622_s25 = smov [#allocation2]   ;;  %s623_s27 = smov [#allocation5]  }
  0x13   : > { %s817_s23 = scalar_select %p698_p10, 1, 0 }
  0x14   : > { %s818_s24 = scalar_select %p702_p11, 1, 0 }
  0x15   : > { %p415_p12 = pneg %p698_p10  ;;  %s129_s26 = sshll.u32 %s622_s25, 4  ;;  %s130_s26 = int_to_ptr.vmem [resolvable:$true] %s129_s26 }
  0x16   : > { %s142_s28 = sshll.u32 %s623_s27, 4  ;;  %s495_s30 = scalar_lea.vmem %s130_s26, 64  ;;  %s143_s28 = int_to_ptr.vmem [resolvable:$true] %s142_s28 }
  0x17   : > { %p710_p13 = pnand %p702_p11, %p415_p12  ;;  %p496_p1 = scmp.ne.s32.totalorder %s130_s26, %s495_s30 }
  0x18   : > { %p503_p5 = scmp.lt.s32.totalorder %s130_s26, %s130_s26  ;;  %p504_p6 = scmp.lt.s32.totalorder %s495_s30, %s495_s30 }
  0x19   : > { %p486_p0 = pneg %p710_p13 }
  0x1a   : > { %p505_p7 = por %p504_p6, %p503_p5 }
  0x1b   : > { %p498_p2 = pnand %p496_p1, %p486_p0 }
  0x1d   : > { %p499_p3 = pneg %p498_p2 }
  0x1f   : > { %p506_p9 = pnand %p505_p7, %p499_p3 }
  0x21   : > { %509 = shalt.err (!%p506_p9)
}
  0x22   : > { %418 = dma.hbm_to_vmem [thread:$0]  (!%p710_p13), %s808_s0, 64, %s130_s26, [#allocation3]  }
  0x23   : > { %s521_s5 = scalar_lea.vmem %s143_s28, 64  ;;  %p529_p1 = scmp.lt.s32.totalorder %s143_s28, %s143_s28 }
  0x24   : > { %p522_p12 = scmp.ne.s32.totalorder %s143_s28, %s521_s5  ;;  %p530_p2 = scmp.lt.s32.totalorder %s521_s5, %s521_s5 }
  0x26   : > { %p524_p8 = pnand %p522_p12, %p486_p0  ;;  %p531_p11 = por %p530_p2, %p529_p1 }
  0x28   : > { %p525_p4 = pneg %p524_p8 }
  0x2a   : > { %p532_p10 = pnand %p531_p11, %p525_p4 }
  0x2c   : > { %535 = shalt.err (!%p532_p10)
}
  0x2d   : > { %421 = dma.hbm_to_vmem [thread:$0]  (!%p710_p13), %s809_s1, 64, %s143_s28, [#allocation6]  }
  0x2e   : > { %p820_p3 = scmp.ne.s32.totalorder %s817_s23, 0 }
  0x2f   : > { %p821_p5 = scmp.ne.s32.totalorder (!%p820_p3), %s818_s24, 0 }
  0x30   : > { %155 = sbr.rel (%p820_p3) target bundleno = 207 (0xcf), region = 28 }
  0x35   : > { %587 = dma.done.wait (%p821_p5), [#allocation3], 64  }
  0x36   : > { %589 = vsyncadd (%p821_p5), [#allocation3], 4294967232 }
  0x37   : > { %591 = dma.done.wait (%p821_p5), [#allocation6], 64  }
  0x38   : > { %593 = vsyncadd (%p821_p5), [#allocation6], 4294967232  ;;  %v179_v0 = vlaneseq  ;;  %v624_v1 = vmov 1966171168   ;;  %v177_v8 = vld [vmem:[#allocation2] sm:$0xf] }
  0x39   : > { %v233_v2 = vunpack.c.l.s4 %v624_v1  ;;  %v398_v9 = vld.sshfl [vmem:[#allocation5] sm:$0x33 pattern:$0x75316420]  ;;  %s173_s8 = sand.u32 1, %s604_s10   ;;  %vm276_vm0 = vcmask 130048  }
  0x3a   : > { %v180_v3 = vshrl.u32 %v179_v0, 7  ;;  %v231_v12 = vcombine.high %v398_v9, %v398_v9  ;;  %s397_s15 = sshll.u32 %s173_s8, 6  ;;  %s404_s18 = sshll.u32 %s612_s12, 10 }
  0x3b   : > { %v234_v4 = vunpack.c.0.s8 %v233_v2  ;;  %s175_s16 = scalar_lea.vmem [#allocation7], %s397_s15  ;;  %s755_s25 = scalar_lea.hbm %s810_s2, %s404_s18 }
  0x3c   : > { %v192_v5 = vsub.s32 1, %v180_v3  ;;  %v181_v6 = vsub.s32 0, %v180_v3  ;;  %v203_v14 = vsub.s32 2, %v180_v3  ;;  %v214_v22 = vsub.s32 3, %v180_v3  ;;  %s302_s20 = sshll.u32 %s175_s16, 4  ;;  %s763_s12 = scalar_lea.sflag [#allocation4], %s173_s8  ;;  %s757_s20 = int_to_ptr.vmem [resolvable:$true] %s302_s20 }
  0x3d   : > { %v237_v7 = vsub.s32 %v234_v4, %v180_v3  ;;  %s536_s26 = scalar_lea.vmem %s757_s20, 1024  ;;  %p822_p8 = scmp.ne.s32.totalorder %s815_s19, 0 }
  0x3e   : > { %v193_v10 = vrot.slane %v177_v8, %v192_v5  ;;  %v182_v11 = vrot.slane %v177_v8, %v181_v6  ;;  %v204_v21 = vrot.slane %v177_v8, %v203_v14  ;;  %v215_v24 = vrot.slane %v177_v8, %v214_v22  ;;  %p537_p4 = scmp.ne.s32.totalorder %s757_s20, %s536_s26  ;;  %s625_s27 = smov [#allocation7]  }
  0x3f   : > { %v238_v13 = vrot.slane %v398_v9, %v237_v7  ;;  %v245_v15 = vrot.slane %v231_v12, %v237_v7  ;;  %s540_s28 = sshll.u32 %s625_s27, 4  ;;  %s541_s28 = int_to_ptr.vmem [resolvable:$false] %s540_s28 }
  0x40   : > { %195 = vbcast.lane.b32.xlu1 %v193_v10, 256  ;;  %184 = vbcast.lane.b32.xlu0 %v182_v11, 256  ;;  %p538_p10 = pnand %p537_p4, %p822_p8  ;;  %s542_s29 = scalar_lea.vmem %s541_s28, 2048 }
  0x41   : > { %v251_v16 = vrot.slane %v238_v13, %v181_v6  ;;  %v246_v17 = vcombine.high %v238_v13, %v238_v13  ;;  %v255_v18 = vrot.slane %v245_v15, %v181_v6  ;;  %v247_v20 = vcombine.high %v245_v15, %v245_v15  ;;  %p543_p13 = scmp.lt.s32.totalorder %s757_s20, %s541_s28  ;;  %p544_p0 = scmp.lt.s32.totalorder %s542_s29, %s536_s26 }
  0x42   : > { %p539_p11 = pneg %p538_p10 }
  0x43   : > { %v259_v19 = vrot.slane %v246_v17, %v181_v6  ;;  %v263_v23 = vrot.slane %v247_v20, %v181_v6  ;;  %p545_p6 = por %p544_p0, %p543_p13 }
  0x44   : > { %199 = vbcast.lane.b32.xlu1 %v193_v10, 264  ;;  %188 = vbcast.lane.b32.xlu0 %v182_v11, 264 }
  0x45   : > { %p546_p7 = pnand %p545_p6, %p539_p11 }
  0x48   : > { %210 = vbcast.lane.b32.xlu1 %v204_v21, 264  ;;  %206 = vbcast.lane.b32.xlu0 %v204_v21, 256 }
  0x4c   : > { %221 = vbcast.lane.b32.xlu1 %v215_v24, 264  ;;  %217 = vbcast.lane.b32.xlu0 %v215_v24, 256 }
  0xb2   : > { %v196_v25 = vpop.permute.xlu1 %195  ;;  %v185_v26 = vpop.permute.xlu0 %184 }
  0xb3   : > { %v270_v27 = vadd.f32 %v255_v18, %v196_v25  ;;  %v268_v28 = vadd.f32 %v251_v16, %v185_v26 }
  0xb5   : > { %279 = vst.msk [vmem:[%s175_s16 + $0x10] sm:$0xff] %vm276_vm0, %v270_v27  ;;  %277 = vst.msk [vmem:[%s175_s16] sm:$0xff] %vm276_vm0, %v268_v28 }
  0xb6   : > { %v200_v29 = vpop.permute.xlu1 %199  ;;  %v189_v30 = vpop.permute.xlu0 %188 }
  0xb7   : > { %v271_v31 = vadd.f32 %v255_v18, %v200_v29  ;;  %v269_v32 = vadd.f32 %v251_v16, %v189_v30 }
  0xb9   : > { %280 = vst.msk [vmem:[%s175_s16 + $0x18] sm:$0xff] %vm276_vm0, %v271_v31  ;;  %278 = vst.msk [vmem:[%s175_s16 + $0x8] sm:$0xff] %vm276_vm0, %v269_v32 }
  0xba   : > { %v211_v33 = vpop.permute.xlu1 %210  ;;  %v207_v34 = vpop.permute.xlu0 %206 }
  0xbb   : > { %v273_v35 = vadd.f32 %v259_v19, %v211_v33  ;;  %v272_v36 = vadd.f32 %v259_v19, %v207_v34 }
  0xbd   : > { %282 = vst.msk [vmem:[%s175_s16 + $0x28] sm:$0xff] %vm276_vm0, %v273_v35  ;;  %281 = vst.msk [vmem:[%s175_s16 + $0x20] sm:$0xff] %vm276_vm0, %v272_v36 }
  0xbe   : > { %v222_v37 = vpop.permute.xlu1 %221  ;;  %v218_v38 = vpop.permute.xlu0 %217 }
  0xbf   : > { %v275_v39 = vadd.f32 %v263_v23, %v222_v37  ;;  %v274_v40 = vadd.f32 %v263_v23, %v218_v38 }
  0xc1   : > { %284 = vst.msk [vmem:[%s175_s16 + $0x38] sm:$0xff] %vm276_vm0, %v275_v39  ;;  %283 = vst.msk [vmem:[%s175_s16 + $0x30] sm:$0xff] %vm276_vm0, %v274_v40 }
  0xc2   : > { %549 = shalt.err (!%p546_p7)
}
  0xc3   : > { %s550_s30 = scalar_lea.hbm %s755_s25, 1024  ;;  %s554_s5 = scalar_lea.hbm %s810_s2, 2048 }
  0xc4   : > { %p551_p9 = scmp.ne.s32.totalorder %s755_s25, %s550_s30  ;;  %p555_p2 = scmp.lt.s32.totalorder %s755_s25, %s810_s2 }
  0xc5   : > { %p556_p3 = scmp.lt.s32.totalorder %s554_s5, %s550_s30 }
  0xc6   : > { %p552_p12 = pnand %p551_p9, %p822_p8 }
  0xc7   : > { %p557_p5 = por %p556_p3, %p555_p2 }
  0xc8   : > { %p553_p1 = pneg %p552_p12 }
  0xca   : > { %p558_p4 = pnand %p557_p5, %p553_p1 }
  0xcc   : > { %561 = shalt.err (!%p558_p4)
}
  0xcd   : > { %s626_s8 = smov 128   ;;  %s627_s15 = smov 8  }
  0xce   : > { %413 = dma.vmem_to_hbm [thread:$0]  (%p822_p8), %s757_s20, 1024, %s755_s25, %s763_s12, %s626_s8, %s626_s8, %s627_s15  }
  0xcf PF: > { %p430_p10 = scmp.ge.s32.totalorder %s620_s14, 2  ;;  %s317_s16 = sand.u32 1, %s600_s9  }
  0xd0   : > { %p823_p11 = scmp.ne.s32.totalorder %s816_s21, 0  ;;  %s318_s18 = scalar_lea.sflag [#allocation4], %s317_s16 }
  0xd2   : > { %p423_p13 = pnand %p430_p10, %p823_p11 }
  0xd4   : > { %p424_p0 = pneg %p423_p13 }
  0xd6   : > { %595 = dma.done.wait (%p424_p0), %s318_s18, 1024  }
  0xd7   : > { %597 = vsyncadd (%p424_p0), %s318_s18, 4294966272  ;;  %s17_s14 = sadd.s32 1, %s620_s14   ;;  %s824_s9 = smov %s604_s10 }
  0xd8   : > { %p14_p6 = scmp.ge.s32.totalorder %s17_s14, 4   ;;  %s825_s10 = smov %s608_s11 }
  0xd9   : > { %s826_s11 = smov %s696_s22  ;;  %s827_s12 = smov %s616_s13 }
  0xda   : > { %s828_s13 = smov %s830_s17  ;;  %16 = sbr.rel (!%p14_p6) target bundleno = 6 (0x6), region = 71 }
  0xdf   :  { %323 = vsyncpa [#allocation3], 1 }
  0xe0   :  { %325 = vsyncpa [#allocation3 + $0x1], 1 }
  0xe1   :  { %326 = vsyncpa [#allocation6], 1 }
  0xe2   :  { %327 = vsyncpa [#allocation4], 1 }
  0xe3   :  { %329 = vsyncpa [#allocation4 + $0x1], 1 }

</bundles_post_ra>
